<compile_context>
chip_gen: v7x
topology: tpu7x:2x2x1
jax: 0.10.0
libtpu: 0.0.40
codegen_flags: <defaults>
</compile_context>

<pallas_src>
import functools

import jax
import jax.numpy as jnp
from jax.experimental import pallas as pl
from jax.experimental.pallas import tpu as pltpu

LANE = 128  # TPU lane width; fc3 output is padded to this for lane-dense stores.


def _mlp_kernel(x_ref, w1_ref, b1_ref, w2_ref, b2_ref, w3_ref, b3_ref, o_ref):
    """Fused forward: fc1->relu->(dropout=identity)->fc2->relu->fc3(pad128)->sigmoid."""
    x = x_ref[...]                                                      # (tb, D)

    h1 = jnp.dot(x, w1_ref[...], preferred_element_type=jnp.float32)   # (tb, 128)
    # NOTE: bias broadcasts happen once per grid step; if an inner loop is ever
    # added here, pre-broadcast b1/b2 outside it (JAX does not CSE broadcasts).
    h1 = jnp.maximum(h1 + b1_ref[...], 0.0)                            # relu

    # TODO(synk): nn.Dropout(0.5) is identity in eval/inference mode; no RNG applied.

    h2 = jnp.dot(h1, w2_ref[...], preferred_element_type=jnp.float32)  # (tb, 64)
    h2 = jnp.maximum(h2 + b2_ref[...], 0.0)                            # relu

    # fc3 padded to 128 output columns -> lane-dense output slab; only column 0
    # is meaningful (padding columns are sigmoid(0)=0.5 and sliced off outside).
    logits = jnp.dot(h2, w3_ref[...], preferred_element_type=jnp.float32)  # (tb, 128)
    logits = logits + b3_ref[...]

    o_ref[...] = jax.nn.sigmoid(logits).astype(o_ref.dtype)


@functools.partial(jax.jit, static_argnames=("block_b",))
def fake_news_forward(x, params, block_b=512):
    """x: (B, input_dim) float32. params: dict of weights/biases. Returns (B, 1)."""
    w1, b1, w2, b2, w3, b3 = (params["w1"], params["b1"], params["w2"],
                              params["b2"], params["w3"], params["b3"])
    B, D = x.shape
    H1 = w1.shape[1]     # 128
    H2 = w2.shape[1]     # 64
    O = w3.shape[1]      # 1
    assert block_b % 8 == 0, "block_b must be a multiple of the sublane width (8)"
    assert O <= LANE

    # Pad fc3 to 128 output columns (lane-dense output, proper MXU tile).
    w3_pad = jnp.zeros((H2, LANE), jnp.float32).at[:, :O].set(w3)
    b3_pad = jnp.zeros((1, LANE), jnp.float32).at[:, :O].set(b3)

    # Pad the batch to a multiple of block_b (padded rows are zeros, discarded).
    B_pad = pl.cdiv(B, block_b) * block_b
    if B_pad != B:
        x = jnp.pad(x, ((0, B_pad - B), (0, 0)))

    grid = (B_pad // block_b,)

    out_pad = pl.pallas_call(
        _mlp_kernel,
        out_shape=jax.ShapeDtypeStruct((B_pad, LANE), jnp.float32),
        grid_spec=pltpu.PrefetchScalarGridSpec(
            num_scalar_prefetch=0,
            grid=grid,
            in_specs=[
                pl.BlockSpec((block_b, D), lambda i: (i, 0)),   # x tile
                pl.BlockSpec((D, H1), lambda i: (0, 0)),        # w1 (resident)
                pl.BlockSpec((1, H1), lambda i: (0, 0)),        # b1
                pl.BlockSpec((H1, H2), lambda i: (0, 0)),       # w2
                pl.BlockSpec((1, H2), lambda i: (0, 0)),        # b2
                pl.BlockSpec((H2, LANE), lambda i: (0, 0)),     # w3 (padded)
                pl.BlockSpec((1, LANE), lambda i: (0, 0)),      # b3 (padded)
            ],
            out_specs=pl.BlockSpec((block_b, LANE), lambda i: (i, 0)),
        ),
        compiler_params=pltpu.CompilerParams(
            dimension_semantics=("parallel",),        # batch axis -> megacore shard
            vmem_limit_bytes=32 * 1024 * 1024,        # explicit budget, v7x-safe
        ),
    )(x, w1, b1, w2, b2, w3_pad, b3_pad)

    # Drop batch padding and the lane padding of the output.
    return out_pad[:B, :O]


def init_params(key, input_dim):
    """Deterministic init mimicking nn.Linear's U(-1/sqrt(fan_in), 1/sqrt(fan_in))."""
    def linear(k, fan_in, fan_out):
        kw, kb = jax.random.split(k)
        bound = 1.0 / jnp.sqrt(fan_in)
        w = jax.random.uniform(kw, (fan_in, fan_out), jnp.float32, -bound, bound)
        b = jax.random.uniform(kb, (1, fan_out), jnp.float32, -bound, bound)
        return w, b

    k1, k2, k3 = jax.random.split(key, 3)
    w1, b1 = linear(k1, input_dim, 128)
    w2, b2 = linear(k2, 128, 64)
    w3, b3 = linear(k3, 64, 1)
    return {"w1": w1, "b1": b1, "w2": w2, "b2": b2, "w3": w3, "b3": b3}


def reference_forward(x, p):
    """Pure-JAX reference for correctness checking."""
    h = jnp.maximum(x @ p["w1"] + p["b1"], 0.0)
    h = jnp.maximum(h @ p["w2"] + p["b2"], 0.0)
    return jax.nn.sigmoid(h @ p["w3"] + p["b3"])


if __name__ == "__main__":
    key = jax.random.PRNGKey(0)
    k_params, k_x = jax.random.split(key)

    batch, input_dim = 200, 32
    params = init_params(k_params, input_dim)
    x = jax.random.normal(k_x, (batch, input_dim), dtype=jnp.float32)
    ref = reference_forward(x, params)

    # block_b=128 keeps the demo grid at 2 steps (exercises the parallel /
    # megacore path) and the batch-padding path (200 -> 256 rows).
    out = jax.block_until_ready(fake_news_forward(x, params, block_b=128))
    assert out.shape == (batch, 1)
    assert jnp.allclose(out, ref, atol=1e-5, rtol=1e-5)

    # Also exercise the default production tile size (block_b=512) with a tiny
    # batch that needs heavy padding (8 -> 512 rows, grid of 1).
    out_small = jax.block_until_ready(fake_news_forward(x[:8], params))
    assert out_small.shape == (8, 1)
    assert jnp.allclose(out_small, ref[:8], atol=1e-5, rtol=1e-5)

    print("KERNEL_OK")
</pallas_src>

<mosaic_0001>
module attributes {stable_mosaic.version = 11 : i64} {
  func.func @_mlp_kernel(%arg0: i32, %arg1: memref<128x32xf32, #tpu.memory_space<vmem>>, %arg2: memref<32x128xf32, #tpu.memory_space<vmem>>, %arg3: memref<1x128xf32, #tpu.memory_space<vmem>>, %arg4: memref<128x64xf32, #tpu.memory_space<vmem>>, %arg5: memref<1x64xf32, #tpu.memory_space<vmem>>, %arg6: memref<64x128xf32, #tpu.memory_space<vmem>>, %arg7: memref<1x128xf32, #tpu.memory_space<vmem>>, %arg8: memref<128x128xf32, #tpu.memory_space<vmem>>) attributes {dimension_semantics = [#tpu.dimension_semantics<parallel>], iteration_bounds = array<i64: 2>, scalar_prefetch = 0 : i64, scratch_operands = 0 : i64, tpu.core_type = #tpu.core_type<tc>, window_params = [{transform_indices = @transform_0, window_bounds = array<i64: 128, 32>}, {pipeline_mode = #tpu.pipeline_mode<synchronous>, transform_indices = @transform_1, window_bounds = array<i64: 32, 128>}, {pipeline_mode = #tpu.pipeline_mode<synchronous>, transform_indices = @transform_2, window_bounds = array<i64: 1, 128>}, {pipeline_mode = #tpu.pipeline_mode<synchronous>, transform_indices = @transform_3, window_bounds = array<i64: 128, 64>}, {pipeline_mode = #tpu.pipeline_mode<synchronous>, transform_indices = @transform_4, window_bounds = array<i64: 1, 64>}, {pipeline_mode = #tpu.pipeline_mode<synchronous>, transform_indices = @transform_5, window_bounds = array<i64: 64, 128>}, {pipeline_mode = #tpu.pipeline_mode<synchronous>, transform_indices = @transform_6, window_bounds = array<i64: 1, 128>}, {transform_indices = @transform_7, window_bounds = array<i64: 128, 128>}]} {
    %c0 = arith.constant 0 : index
    %c0_0 = arith.constant 0 : index
    %0 = vector.load %arg1[%c0, %c0_0] : memref<128x32xf32, #tpu.memory_space<vmem>>, vector<128x32xf32>
    %c0_1 = arith.constant 0 : index
    %c0_2 = arith.constant 0 : index
    %1 = vector.load %arg2[%c0_1, %c0_2] : memref<32x128xf32, #tpu.memory_space<vmem>>, vector<32x128xf32>
    %cst = arith.constant dense<0.000000e+00> : vector<128x128xf32>
    %2 = tpu.matmul %0, %1, %cst {dimension_numbers = #tpu.dot_dimension_numbers<[1], [0], [0], [1], [0, 0, 1, 1], [], []>} : vector<128x32xf32>, vector<32x128xf32>, vector<128x128xf32> -> vector<128x128xf32>
    %c0_3 = arith.constant 0 : index
    %c0_4 = arith.constant 0 : index
    %3 = vector.load %arg3[%c0_3, %c0_4] : memref<1x128xf32, #tpu.memory_space<vmem>>, vector<1x128xf32>
    %4 = vector.broadcast %3 : vector<1x128xf32> to vector<128x128xf32>
    %5 = arith.addf %2, %4 : vector<128x128xf32>
    %cst_5 = arith.constant 0.000000e+00 : f32
    %6 = vector.broadcast %cst_5 : f32 to vector<128x128xf32>
    %7 = arith.maximumf %5, %6 : vector<128x128xf32>
    %c0_6 = arith.constant 0 : index
    %c0_7 = arith.constant 0 : index
    %8 = vector.load %arg4[%c0_6, %c0_7] : memref<128x64xf32, #tpu.memory_space<vmem>>, vector<128x64xf32>
    %cst_8 = arith.constant dense<0.000000e+00> : vector<128x64xf32>
    %9 = tpu.matmul %7, %8, %cst_8 {dimension_numbers = #tpu.dot_dimension_numbers<[1], [0], [0], [1], [0, 0, 1, 1], [], []>} : vector<128x128xf32>, vector<128x64xf32>, vector<128x64xf32> -> vector<128x64xf32>
    %c0_9 = arith.constant 0 : index
    %c0_10 = arith.constant 0 : index
    %10 = vector.load %arg5[%c0_9, %c0_10] : memref<1x64xf32, #tpu.memory_space<vmem>>, vector<1x64xf32>
    %11 = vector.broadcast %10 : vector<1x64xf32> to vector<128x64xf32>
    %12 = arith.addf %9, %11 : vector<128x64xf32>
    %cst_11 = arith.constant 0.000000e+00 : f32
    %13 = vector.broadcast %cst_11 : f32 to vector<128x64xf32>
    %14 = arith.maximumf %12, %13 : vector<128x64xf32>
    %c0_12 = arith.constant 0 : index
    %c0_13 = arith.constant 0 : index
    %15 = vector.load %arg6[%c0_12, %c0_13] : memref<64x128xf32, #tpu.memory_space<vmem>>, vector<64x128xf32>
    %cst_14 = arith.constant dense<0.000000e+00> : vector<128x128xf32>
    %16 = tpu.matmul %14, %15, %cst_14 {dimension_numbers = #tpu.dot_dimension_numbers<[1], [0], [0], [1], [0, 0, 1, 1], [], []>} : vector<128x64xf32>, vector<64x128xf32>, vector<128x128xf32> -> vector<128x128xf32>
    %c0_15 = arith.constant 0 : index
    %c0_16 = arith.constant 0 : index
    %17 = vector.load %arg7[%c0_15, %c0_16] : memref<1x128xf32, #tpu.memory_space<vmem>>, vector<1x128xf32>
    %18 = vector.broadcast %17 : vector<1x128xf32> to vector<128x128xf32>
    %19 = arith.addf %16, %18 : vector<128x128xf32>
    %20 = arith.negf %19 : vector<128x128xf32>
    %21 = math.exp %20 : vector<128x128xf32>
    %cst_17 = arith.constant 1.000000e+00 : f32
    %22 = vector.broadcast %cst_17 : f32 to vector<128x128xf32>
    %23 = arith.addf %22, %21 : vector<128x128xf32>
    %24 = arith.divf %22, %23 : vector<128x128xf32>
    %c0_18 = arith.constant 0 : index
    %c0_19 = arith.constant 0 : index
    %25 = vector.load %arg8[%c0_18, %c0_19] : memref<128x128xf32, #tpu.memory_space<vmem>>, vector<128x128xf32>
    tpu.vector_store %arg8[%c0_18, %c0_19], %24 {strides = array<i32>} : memref<128x128xf32, #tpu.memory_space<vmem>>, vector<128x128xf32>,
    return
  }
  func.func @transform_0(%arg0: i32) -> (i32, i32) {
    %c0_i32 = arith.constant 0 : i32
    %c0_i32_0 = arith.constant 0 : i32
    return %arg0, %c0_i32 : i32, i32
  }
  func.func @transform_1(%arg0: i32) -> (i32, i32) {
    %c0_i32 = arith.constant 0 : i32
    %c0_i32_0 = arith.constant 0 : i32
    %c0_i32_1 = arith.constant 0 : i32
    return %c0_i32, %c0_i32_0 : i32, i32
  }
  func.func @transform_2(%arg0: i32) -> (i32, i32) {
    %c0_i32 = arith.constant 0 : i32
    %c0_i32_0 = arith.constant 0 : i32
    %c0_i32_1 = arith.constant 0 : i32
    return %c0_i32, %c0_i32_0 : i32, i32
  }
  func.func @transform_3(%arg0: i32) -> (i32, i32) {
    %c0_i32 = arith.constant 0 : i32
    %c0_i32_0 = arith.constant 0 : i32
    %c0_i32_1 = arith.constant 0 : i32
    return %c0_i32, %c0_i32_0 : i32, i32
  }
  func.func @transform_4(%arg0: i32) -> (i32, i32) {
    %c0_i32 = arith.constant 0 : i32
    %c0_i32_0 = arith.constant 0 : i32
    %c0_i32_1 = arith.constant 0 : i32
    return %c0_i32, %c0_i32_0 : i32, i32
  }
  func.func @transform_5(%arg0: i32) -> (i32, i32) {
    %c0_i32 = arith.constant 0 : i32
    %c0_i32_0 = arith.constant 0 : i32
    %c0_i32_1 = arith.constant 0 : i32
    return %c0_i32, %c0_i32_0 : i32, i32
  }
  func.func @transform_6(%arg0: i32) -> (i32, i32) {
    %c0_i32 = arith.constant 0 : i32
    %c0_i32_0 = arith.constant 0 : i32
    %c0_i32_1 = arith.constant 0 : i32
    return %c0_i32, %c0_i32_0 : i32, i32
  }
  func.func @transform_7(%arg0: i32) -> (i32, i32) {
    %c0_i32 = arith.constant 0 : i32
    %c0_i32_0 = arith.constant 0 : i32
    return %arg0, %c0_i32 : i32, i32
  }
}

</mosaic_0001>

<bundles_post_ra>
// kernel: fake_news_forward.1
= control target key start
LH: loop header
LB: loop body
LE: loop exit
PB: predicated region body
PF: predicated region fallthrough
CT: control target
= control target key end

     0   :  { %s1530_s24 = smov 0   ;;  %s1751_s0 = inlined_call_operand.vmem [shape: f32[256,32], index: 0, kind: input, shape index: {}]   ;;  %s1752_s1 = inlined_call_operand.vmem [shape: f32[32,128], index: 1, kind: input, shape index: {}]   ;;  %s1753_s2 = inlined_call_operand.vmem [shape: f32[1,128], index: 2, kind: input, shape index: {}]   ;;  %s1754_s3 = inlined_call_operand.vmem [shape: f32[128,64], index: 3, kind: input, shape index: {}]   ;;  %s1755_s4 = inlined_call_operand.vmem [shape: f32[1,64], index: 4, kind: input, shape index: {}]   ;;  %s1756_s5 = inlined_call_operand.vmem [shape: f32[64,128], index: 5, kind: input, shape index: {}]   ;;  %s1757_s6 = inlined_call_operand.vmem [shape: f32[1,128], index: 6, kind: input, shape index: {}]   ;;  %s1758_s7 = inlined_call_operand.vmem [shape: f32[256,128], index: 7, kind: output, shape index: {}]  }
   0x1 LB: > { %s1080_s25 = sadd.s32 4294967295, %s1488_s24   ;;  %p1084_p0 = scmp.ge.s32.totalorder %s1488_s24, 1  ;;  %s1488_s24 = sphi %s1530_s24, %s17_s24  }
   0x2   : > { %p238_p1 = scmp.lt.s32.totalorder %s1488_s24, 3 }
   0x4   : > { %p239_p2 = pnand %p1084_p0, %p238_p1 }
   0x5   : > { %v298_v0 = vld [vmem:[%s1752_s1] sm:$0xff] (!%p239_p2)  ;;  %v299_v1 = vld [vmem:[%s1752_s1 + $0x8] sm:$0xff] (!%p239_p2)  ;;  %v300_v2 = vld [vmem:[%s1752_s1 + $0x10] sm:$0xff] (!%p239_p2)  ;;  %s1085_s9 = sshll.u32 (!%p239_p2), %s1080_s25, 4  ;;  %vm309_vm0 = vcmask (!%p239_p2), 261120   ;;  %vm718_vm1 = vcmask (!%p239_p2), 523264  }
   0x6   : > { %242 = sbr.rel (%p239_p2) target bundleno = 726 (0x2d6), region = 48  ;;  %v1346_v3 = vpack.c.bf16 (!%p239_p2), %v299_v1, %v298_v0  ;;  %v301_v4 = vld [vmem:[%s1752_s1 + $0x18] sm:$0xff] (!%p239_p2)  ;;  %p271_p3 = scmp.lt.s32.totalorder (!%p239_p2), %s1085_s9, 31  ;;  %v519_v5 = vld [vmem:[%s1754_s3] sm:$0xff] (!%p239_p2)  ;;  %v520_v6 = vld [vmem:[%s1754_s3 + $0x8] sm:$0xff] (!%p239_p2) }
   0x7   : > { %v1350_v7 = vpack.c.bf16 (!%p239_p2), %v301_v4, %v300_v2  ;;  %v1354_v8 = vpack.c.bf16 (!%p239_p2), %v520_v6, %v519_v5  ;;  %v521_v9 = vld [vmem:[%s1754_s3 + $0x10] sm:$0xff] (!%p239_p2)  ;;  %v522_v10 = vld [vmem:[%s1754_s3 + $0x18] sm:$0xff] (!%p239_p2)  ;;  %v523_v12 = vld [vmem:[%s1754_s3 + $0x20] sm:$0xff] (!%p239_p2) }
   0x8   : > { %1347 = vmatprep.subr.bf16.mxu0 (!%p239_p2), %v1346_v3  ;;  %v1358_v11 = vpack.c.bf16 (!%p239_p2), %v522_v10, %v521_v9  ;;  %v524_v13 = vld [vmem:[%s1754_s3 + $0x28] sm:$0xff] (!%p239_p2)  ;;  %v525_v16 = vld [vmem:[%s1754_s3 + $0x30] sm:$0xff] (!%p239_p2)  ;;  %v526_v17 = vld [vmem:[%s1754_s3 + $0x38] sm:$0xff] (!%p239_p2) }
   0x9   : > { %1349 = vmatpush3.bf16.msra.mxu0 (!%p239_p2), %v1346_v3  ;;  %1355 = vmatprep.subr.bf16.mxu1 (!%p239_p2), %v1354_v8  ;;  %v1362_v14 = vpack.c.bf16 (!%p239_p2), %v524_v13, %v523_v12  ;;  %v1366_v20 = vpack.c.bf16 (!%p239_p2), %v526_v17, %v525_v16  ;;  %v527_v21 = vld [vmem:[%s1754_s3 + $0x40] sm:$0xff] (!%p239_p2)  ;;  %v528_v22 = vld [vmem:[%s1754_s3 + $0x48] sm:$0xff] (!%p239_p2)  ;;  %v529_v26 = vld [vmem:[%s1754_s3 + $0x50] sm:$0xff] (!%p239_p2) }
   0xa   : > { %1351 = vmatprep.subr.bf16.mxu0 (!%p239_p2), %v1350_v7  ;;  %1357 = vmatpush3.bf16.msra.mxu1 (!%p239_p2), %v1354_v8  ;;  %v1370_v25 = vpack.c.bf16 (!%p239_p2), %v528_v22, %v527_v21  ;;  %v530_v27 = vld [vmem:[%s1754_s3 + $0x58] sm:$0xff] (!%p239_p2)  ;;  %v531_v31 = vld [vmem:[%s1754_s3 + $0x60] sm:$0xff] (!%p239_p2)  ;;  %v532_v32 = vld [vmem:[%s1754_s3 + $0x68] sm:$0xff] (!%p239_p2) }
   0xb   : > { %1359 = vmatprep.subr.bf16.mxu1 (!%p239_p2), %v1358_v11  ;;  %v1374_v30 = vpack.c.bf16 (!%p239_p2), %v530_v27, %v529_v26  ;;  %v1378_v35 = vpack.c.bf16 (!%p239_p2), %v532_v32, %v531_v31  ;;  %v533_v43 = vld [vmem:[%s1754_s3 + $0x70] sm:$0xff] (!%p239_p2)  ;;  %v534_v44 = vld [vmem:[%s1754_s3 + $0x78] sm:$0xff] (!%p239_p2)  ;;  %v703_v46 = vld [vmem:[%s1756_s5] sm:$0xff] (!%p239_p2) }
   0xc   : > { %v1382_v45 = vpack.c.bf16 (!%p239_p2), %v534_v44, %v533_v43  ;;  %v704_v47 = vld [vmem:[%s1756_s5 + $0x8] sm:$0xff] (!%p239_p2)  ;;  %v705_v48 = vld [vmem:[%s1756_s5 + $0x10] sm:$0xff] (!%p239_p2)  ;;  %v706_v50 = vld [vmem:[%s1756_s5 + $0x18] sm:$0xff] (!%p239_p2) }
   0xd   : > { %s1760_s9 = smov (!%p271_p3, %s1085_s9), 31  ;;  %1353 = vmatpush3.bf16.msra.mxu0 %v1350_v7  ;;  %v1386_v49 = vpack.c.bf16 %v704_v47, %v703_v46  ;;  %v1390_v51 = vpack.c.bf16 %v706_v50, %v705_v48  ;;  %v707_v52 = vld [vmem:[%s1756_s5 + $0x20] sm:$0xff]  ;;  %v708_v53 = vld [vmem:[%s1756_s5 + $0x28] sm:$0xff] }
   0xe   : > { %s1086_s25 = sshll.u32 %s1760_s9, 3  ;;  %1361 = vmatpush3.bf16.msra.mxu1 %v1358_v11  ;;  %v1394_v54 = vpack.c.bf16 %v708_v53, %v707_v52  ;;  %v1661_v55 = vld [vmem:[%s1753_s2] ss:$0 sm:$0xff] }
   0xf   : > { %s1576_s28 = scalar_lea.vmem %s1751_s0, %s1086_s25  ;;  %1363 = vmatprep.subr.bf16.mxu1 %v1362_v14  ;;  %1387 = vmatprep.subr.bf16.mxu0 %v1386_v49  ;;  %v1106_v43 = vld [vmem:[%s1755_s4] ss:$0 sm:$0xff] }
  0x10   : > { %v282_v15 = vld [vmem:[%s1576_s28] sm:$0xff]  ;;  %v283_v18 = vld [vmem:[%s1576_s28 + $0x8] sm:$0xff]  ;;  %v284_v19 = vld [vmem:[%s1576_s28 + $0x10] sm:$0xff] }
  0x11   : > { %1226 = vmatprep.mubr.msk.f32.mxu0 %vm309_vm0, %v282_v15  ;;  %v285_v23 = vld [vmem:[%s1576_s28 + $0x18] sm:$0xff]  ;;  %v286_v24 = vld [vmem:[%s1576_s28 + $0x20] sm:$0xff]  ;;  %v287_v28 = vld [vmem:[%s1576_s28 + $0x28] sm:$0xff] }
  0x12   : > { %1227 = vmatmul.mubr.msk.f32.vlgmr.msra.gmra.mrb[0].mxu0 %vm309_vm0, %v283_v18  ;;  %1365 = vmatpush3.bf16.msra.mxu1 %v1362_v14  ;;  %v288_v29 = vld [vmem:[%s1576_s28 + $0x30] sm:$0xff]  ;;  %v289_v33 = vld [vmem:[%s1576_s28 + $0x38] sm:$0xff]  ;;  %v290_v34 = vld [vmem:[%s1576_s28 + $0x40] sm:$0xff] }
  0x13   : > { %1229 = vmatprep.mubr.msk.f32.mxu0 %vm309_vm0, %v284_v19  ;;  %1367 = vmatprep.subr.bf16.mxu1 %v1366_v20  ;;  %v291_v36 = vld [vmem:[%s1576_s28 + $0x48] sm:$0xff]  ;;  %v292_v37 = vld [vmem:[%s1576_s28 + $0x50] sm:$0xff]  ;;  %v293_v38 = vld [vmem:[%s1576_s28 + $0x58] sm:$0xff] }
  0x14   : > { %v294_v39 = vld [vmem:[%s1576_s28 + $0x60] sm:$0xff]  ;;  %v295_v40 = vld [vmem:[%s1576_s28 + $0x68] sm:$0xff]  ;;  %v296_v41 = vld [vmem:[%s1576_s28 + $0x70] sm:$0xff]  ;;  %1389 = vmatpush3.bf16.msra.mxu0 %v1386_v49 }
  0x15   : > { %v297_v42 = vld [vmem:[%s1576_s28 + $0x78] sm:$0xff]  ;;  %1391 = vmatprep.subr.bf16.mxu0 %v1390_v51  ;;  %s1727_s28 = scalar_lea.vmem %s1758_s7, %s1086_s25 }
  0x16   : > { %1230 = vmatmul.mubr.msk.f32.gmra.mrb[2].mxu0 %vm309_vm0, %v285_v23  ;;  %1369 = vmatpush3.bf16.msra.mxu1 %v1366_v20 }
  0x17   : > { %1232 = vmatprep.mubr.msk.f32.mxu0 %vm309_vm0, %v286_v24  ;;  %1371 = vmatprep.subr.bf16.mxu1 %v1370_v25 }
  0x18   : > { %1393 = vmatpush3.bf16.msra.mxu0 %v1390_v51 }
  0x19   : > { %1395 = vmatprep.subr.bf16.mxu0 %v1394_v54 }
  0x1a   : > { %1233 = vmatmul.mubr.msk.f32.gmra.mrb[4].mxu0 %vm309_vm0, %v287_v28  ;;  %1373 = vmatpush3.bf16.msra.mxu1 %v1370_v25 }
  0x1b   : > { %1235 = vmatprep.mubr.msk.f32.mxu0 %vm309_vm0, %v288_v29  ;;  %1375 = vmatprep.subr.bf16.mxu1 %v1374_v30 }
  0x1c   : > { %1397 = vmatpush3.bf16.msra.mxu0 %v1394_v54 }
  0x1e   : > { %1236 = vmatmul.mubr.msk.f32.gmra.mrb[6].mxu0 %vm309_vm0, %v289_v33  ;;  %1377 = vmatpush3.bf16.msra.mxu1 %v1374_v30 }
  0x1f   : > { %1238 = vmatprep.mubr.msk.f32.mxu0 %vm309_vm0, %v290_v34  ;;  %1379 = vmatprep.subr.bf16.mxu1 %v1378_v35 }
  0x22   : > { %1239 = vmatmul.mubr.msk.f32.gmra.mrb[8].mxu0 %vm309_vm0, %v291_v36  ;;  %1381 = vmatpush3.bf16.msra.mxu1 %v1378_v35 }
  0x23   : > { %1241 = vmatprep.mubr.msk.f32.mxu0 %vm309_vm0, %v292_v37  ;;  %1383 = vmatprep.subr.bf16.mxu1 %v1382_v45 }
  0x26   : > { %1242 = vmatmul.mubr.msk.f32.gmra.mrb[10].mxu0 %vm309_vm0, %v293_v38  ;;  %1385 = vmatpush3.bf16.msra.mxu1 %v1382_v45 }
  0x27   : > { %1244 = vmatprep.mubr.msk.f32.mxu0 %vm309_vm0, %v294_v39  ;;  %1402 = vmatprep.subr.bf16.mxu1 %v1386_v49 }
  0x2a   : > { %1245 = vmatmul.mubr.msk.f32.gmra.mrb[12].mxu0 %vm309_vm0, %v295_v40  ;;  %v709_v40 = vld [vmem:[%s1756_s5 + $0x30] sm:$0xff] }
  0x2b   : > { %1247 = vmatprep.mubr.msk.f32.mxu0 %vm309_vm0, %v296_v41  ;;  %v710_v41 = vld [vmem:[%s1756_s5 + $0x38] sm:$0xff] }
  0x2e   : > { %1248 = vmatmul.mubr.msk.f32.gmra.mrb[14].mxu0 %vm309_vm0, %v297_v42  ;;  %v1398_v42 = vpack.c.bf16 %v710_v41, %v709_v40 }
  0x30   : > { %1399 = vmatprep.subr.bf16.mxu0 %v1398_v42 }
  0x31   : > { %1401 = vmatpush3.bf16.msra.mxu0 %v1398_v42 }
  0xe5   : > { %v1228_v56 = vpop.f32.mrb[0].mxu0 }
  0xe6   : > { %v430_v57 = vadd.f32 %v1228_v56, %v1661_v55  ;;  %v424_v58 = vpop.f32.mrb[1].mxu0 }
  0xe7   : > { %v425_v59 = vadd.f32 %v1661_v55, %v424_v58 }
  0xe8   : > { %v504_v62 = vmax.f32 %v430_v57, 0.0 }
  0xe9   : > { %v1231_v60 = vpop.f32.mrb[2].mxu0  ;;  %v503_v61 = vmax.f32 %v425_v59, 0.0 }
  0xea   : > { %v440_v63 = vadd.f32 %v1231_v60, %v1661_v55  ;;  %v434_v0 = vpop.f32.mrb[3].mxu0 }
  0xeb   : > { %v435_v1 = vadd.f32 %v1661_v55, %v434_v0  ;;  %1282 = vmatprep.mubr.f32.mxu1 %v503_v61 }
  0xec   : > { %1283 = vmatmul.mubr.f32.vlgmr.msra.gmra.mrb[0].mxu1 %v504_v62  ;;  %v506_v4 = vmax.f32 %v440_v63, 0.0 }
  0xed   : > { %v505_v2 = vmax.f32 %v435_v1, 0.0  ;;  %v1234_v3 = vpop.f32.mrb[4].mxu0  ;;  %1406 = vmatpush3.bf16.msra.mxu1 %v1386_v49 }
  0xee   : > { %v450_v5 = vadd.f32 %v1234_v3, %v1661_v55  ;;  %v444_v6 = vpop.f32.mrb[5].mxu0  ;;  %1403 = vmatprep.subr.bf16.mxu1 %v1390_v51 }
  0xef   : > { %v445_v7 = vadd.f32 %v1661_v55, %v444_v6  ;;  %1285 = vmatprep.mubr.f32.mxu1 %v505_v2 }
  0xf0   : > { %1286 = vmatmul.mubr.f32.gmra.mrb[2].mxu1 %v506_v4  ;;  %v508_v10 = vmax.f32 %v450_v5, 0.0 }
  0xf1   : > { %v507_v8 = vmax.f32 %v445_v7, 0.0  ;;  %v1237_v9 = vpop.f32.mrb[6].mxu0  ;;  %1407 = vmatpush3.bf16.msra.mxu1 %v1390_v51 }
  0xf2   : > { %v460_v11 = vadd.f32 %v1237_v9, %v1661_v55  ;;  %v454_v12 = vpop.f32.mrb[7].mxu0  ;;  %1404 = vmatprep.subr.bf16.mxu1 %v1394_v54 }
  0xf3   : > { %v455_v13 = vadd.f32 %v1661_v55, %v454_v12  ;;  %1288 = vmatprep.mubr.f32.mxu1 %v507_v8 }
  0xf4   : > { %1289 = vmatmul.mubr.f32.gmra.mrb[4].mxu1 %v508_v10  ;;  %v510_v16 = vmax.f32 %v460_v11, 0.0 }
  0xf5   : > { %v509_v14 = vmax.f32 %v455_v13, 0.0  ;;  %v1240_v15 = vpop.f32.mrb[8].mxu0  ;;  %1408 = vmatpush3.bf16.msra.mxu1 %v1394_v54 }
  0xf6   : > { %v470_v17 = vadd.f32 %v1240_v15, %v1661_v55  ;;  %v464_v18 = vpop.f32.mrb[9].mxu0  ;;  %1405 = vmatprep.subr.bf16.mxu1 %v1398_v42 }
  0xf7   : > { %v465_v19 = vadd.f32 %v1661_v55, %v464_v18  ;;  %1291 = vmatprep.mubr.f32.mxu1 %v509_v14 }
  0xf8   : > { %1292 = vmatmul.mubr.f32.gmra.mrb[6].mxu1 %v510_v16  ;;  %v512_v22 = vmax.f32 %v470_v17, 0.0 }
  0xf9   : > { %v511_v20 = vmax.f32 %v465_v19, 0.0  ;;  %v1243_v21 = vpop.f32.mrb[10].mxu0  ;;  %1409 = vmatpush3.bf16.msra.mxu1 %v1398_v42 }
  0xfa   : > { %v480_v23 = vadd.f32 %v1243_v21, %v1661_v55  ;;  %v474_v24 = vpop.f32.mrb[11].mxu0 }
  0xfb   : > { %v475_v25 = vadd.f32 %v1661_v55, %v474_v24  ;;  %1294 = vmatprep.mubr.f32.mxu1 %v511_v20 }
  0xfc   : > { %1295 = vmatmul.mubr.f32.gmra.mrb[8].mxu1 %v512_v22  ;;  %v514_v28 = vmax.f32 %v480_v23, 0.0 }
  0xfd   : > { %v513_v26 = vmax.f32 %v475_v25, 0.0  ;;  %v1246_v27 = vpop.f32.mrb[12].mxu0 }
  0xfe   : > { %v490_v29 = vadd.f32 %v1246_v27, %v1661_v55  ;;  %v484_v30 = vpop.f32.mrb[13].mxu0 }
  0xff   : > { %v485_v31 = vadd.f32 %v1661_v55, %v484_v30  ;;  %1297 = vmatprep.mubr.f32.mxu1 %v513_v26 }
 0x100   : > { %1298 = vmatmul.mubr.f32.gmra.mrb[10].mxu1 %v514_v28  ;;  %v516_v34 = vmax.f32 %v490_v29, 0.0  ;;  %v1707_v28 = vld [vmem:[%s1757_s6] ss:$0 sm:$0xff] }
 0x101   : > { %v515_v32 = vmax.f32 %v485_v31, 0.0  ;;  %v1249_v33 = vpop.f32.mrb[14].mxu0 }
 0x102   : > { %v500_v35 = vadd.f32 %v1249_v33, %v1661_v55  ;;  %v494_v36 = vpop.f32.mrb[15].mxu0 }
 0x103   : > { %v495_v37 = vadd.f32 %v1661_v55, %v494_v36  ;;  %1300 = vmatprep.mubr.f32.mxu1 %v515_v32 }
 0x104   : > { %1301 = vmatmul.mubr.f32.gmra.mrb[12].mxu1 %v516_v34  ;;  %v518_v39 = vmax.f32 %v500_v35, 0.0 }
 0x105   : > { %v517_v38 = vmax.f32 %v495_v37, 0.0 }
 0x107   : > { %1303 = vmatprep.mubr.f32.mxu1 %v517_v38 }
 0x108   : > { %1304 = vmatmul.mubr.f32.gmra.mrb[14].mxu1 %v518_v39 }
 0x1bf   : > { %v1284_v44 = vpop.f32.mrb[0].mxu1 }
 0x1c0   : > { %v614_v45 = vadd.f32 %v1284_v44, %v1106_v43  ;;  %v608_v46 = vpop.f32.mrb[1].mxu1 }
 0x1c1   : > { %v609_v47 = vadd.f32 %v1106_v43, %v608_v46 }
 0x1c2   : > { %v688_v50 = vmax.f32 %v614_v45, 0.0 }
 0x1c3   : > { %v687_v48 = vmax.f32 %v609_v47, 0.0  ;;  %v1287_v49 = vpop.f32.mrb[2].mxu1 }
 0x1c4   : > { %v624_v51 = vadd.f32 %v1287_v49, %v1106_v43  ;;  %v618_v52 = vpop.f32.mrb[3].mxu1 }
 0x1c5   : > { %v619_v53 = vadd.f32 %v1106_v43, %v618_v52  ;;  %1322 = vmatprep.mubr.msk.f32.mxu0 %vm718_vm1, %v687_v48 }
 0x1c6   : > { %1323 = vmatmul.mubr.msk.f32.vlgmr.msra.gmra.mrb[16].mxu0 %vm718_vm1, %v688_v50  ;;  %v690_v56 = vmax.f32 %v624_v51, 0.0 }
 0x1c7   : > { %v689_v54 = vmax.f32 %v619_v53, 0.0  ;;  %v1290_v55 = vpop.f32.mrb[4].mxu1 }
 0x1c8   : > { %v634_v57 = vadd.f32 %v1290_v55, %v1106_v43  ;;  %v628_v58 = vpop.f32.mrb[5].mxu1 }
 0x1c9   : > { %v629_v59 = vadd.f32 %v1106_v43, %v628_v58  ;;  %1325 = vmatprep.mubr.msk.f32.mxu0 %vm718_vm1, %v689_v54 }
 0x1ca   : > { %1326 = vmatmul.mubr.msk.f32.gmra.mrb[18].mxu0 %vm718_vm1, %v690_v56  ;;  %v692_v62 = vmax.f32 %v634_v57, 0.0 }
 0x1cb   : > { %v691_v60 = vmax.f32 %v629_v59, 0.0  ;;  %v1293_v61 = vpop.f32.mrb[6].mxu1 }
 0x1cc   : > { %v644_v63 = vadd.f32 %v1293_v61, %v1106_v43  ;;  %v638_v0 = vpop.f32.mrb[7].mxu1 }
 0x1cd   : > { %v639_v1 = vadd.f32 %v1106_v43, %v638_v0  ;;  %1328 = vmatprep.mubr.msk.f32.mxu0 %vm718_vm1, %v691_v60 }
 0x1ce   : > { %1329 = vmatmul.mubr.msk.f32.gmra.mrb[20].mxu0 %vm718_vm1, %v692_v62  ;;  %v694_v4 = vmax.f32 %v644_v63, 0.0 }
 0x1cf   : > { %v693_v2 = vmax.f32 %v639_v1, 0.0  ;;  %v1296_v3 = vpop.f32.mrb[8].mxu1 }
 0x1d0   : > { %v654_v5 = vadd.f32 %v1296_v3, %v1106_v43  ;;  %v648_v6 = vpop.f32.mrb[9].mxu1 }
 0x1d1   : > { %v649_v7 = vadd.f32 %v1106_v43, %v648_v6  ;;  %1331 = vmatprep.mubr.msk.f32.mxu0 %vm718_vm1, %v693_v2 }
 0x1d2   : > { %1332 = vmatmul.mubr.msk.f32.gmra.mrb[22].mxu0 %vm718_vm1, %v694_v4  ;;  %v696_v10 = vmax.f32 %v654_v5, 0.0 }
 0x1d3   : > { %v695_v8 = vmax.f32 %v649_v7, 0.0  ;;  %v1299_v9 = vpop.f32.mrb[10].mxu1 }
 0x1d4   : > { %v664_v11 = vadd.f32 %v1299_v9, %v1106_v43  ;;  %v658_v12 = vpop.f32.mrb[11].mxu1 }
 0x1d5   : > { %v659_v13 = vadd.f32 %v1106_v43, %v658_v12  ;;  %1334 = vmatprep.mubr.msk.f32.mxu0 %vm718_vm1, %v695_v8 }
 0x1d6   : > { %1335 = vmatmul.mubr.msk.f32.gmra.mrb[24].mxu0 %vm718_vm1, %v696_v10  ;;  %v698_v16 = vmax.f32 %v664_v11, 0.0 }
 0x1d7   : > { %v697_v14 = vmax.f32 %v659_v13, 0.0  ;;  %v1302_v15 = vpop.f32.mrb[12].mxu1 }
 0x1d8   : > { %v674_v17 = vadd.f32 %v1302_v15, %v1106_v43  ;;  %v668_v18 = vpop.f32.mrb[13].mxu1 }
 0x1d9   : > { %v669_v19 = vadd.f32 %v1106_v43, %v668_v18  ;;  %1337 = vmatprep.mubr.msk.f32.mxu0 %vm718_vm1, %v697_v14 }
 0x1da   : > { %1338 = vmatmul.mubr.msk.f32.gmra.mrb[26].mxu0 %vm718_vm1, %v698_v16  ;;  %v700_v22 = vmax.f32 %v674_v17, 0.0 }
 0x1db   : > { %v699_v20 = vmax.f32 %v669_v19, 0.0  ;;  %v1305_v21 = vpop.f32.mrb[14].mxu1 }
 0x1dc   : > { %v684_v23 = vadd.f32 %v1305_v21, %v1106_v43  ;;  %v678_v24 = vpop.f32.mrb[15].mxu1 }
 0x1dd   : > { %v679_v25 = vadd.f32 %v1106_v43, %v678_v24  ;;  %1340 = vmatprep.mubr.msk.f32.mxu0 %vm718_vm1, %v699_v20 }
 0x1de   : > { %1341 = vmatmul.mubr.msk.f32.gmra.mrb[28].mxu0 %vm718_vm1, %v700_v22  ;;  %v702_v27 = vmax.f32 %v684_v23, 0.0 }
 0x1df   : > { %v701_v26 = vmax.f32 %v679_v25, 0.0 }
 0x1e1   : > { %1343 = vmatprep.mubr.msk.f32.mxu1 %vm718_vm1, %v701_v26 }
 0x1e2   : > { %1344 = vmatmul.mubr.msk.f32.vlgmr.msra.gmra.mrb[16].mxu1 %vm718_vm1, %v702_v27 }
 0x299   : > { %v1324_v29 = vpop.f32.mrb[16].mxu0 }
 0x29a   : > { %v839_v30 = vadd.f32 %v1324_v29, %v1707_v28  ;;  %v833_v31 = vpop.f32.mrb[17].mxu0 }
 0x29b   : > { %v834_v32 = vadd.f32 %v1707_v28, %v833_v31 }
 0x29c   : > { %v1125_v33 = vmul.f32 -1.442695, %v839_v30 }
 0x29d   : > { %v1124_v34 = vmul.f32 -1.442695, %v834_v32  ;;  %v1327_v35 = vpop.f32.mrb[18].mxu0 }
 0x29e   : > { %1418 = vpow2.f32 %v1125_v33  ;;  %v849_v36 = vadd.f32 %v1327_v35, %v1707_v28  ;;  %v843_v37 = vpop.f32.mrb[19].mxu0 }
 0x29f   : > { %1420 = vpow2.f32 %v1124_v34  ;;  %v844_v38 = vadd.f32 %v1707_v28, %v843_v37 }
 0x2a0   : > { %v1127_v39 = vmul.f32 -1.442695, %v849_v36 }
 0x2a1   : > { %v1126_v40 = vmul.f32 -1.442695, %v844_v38  ;;  %v1330_v41 = vpop.f32.mrb[20].mxu0 }
 0x2a2   : > { %1422 = vpow2.f32 %v1127_v39  ;;  %v859_v42 = vadd.f32 %v1330_v41, %v1707_v28  ;;  %v853_v43 = vpop.f32.mrb[21].mxu0 }
 0x2a3   : > { %1424 = vpow2.f32 %v1126_v40  ;;  %v854_v44 = vadd.f32 %v1707_v28, %v853_v43 }
 0x2a4   : > { %v1129_v45 = vmul.f32 -1.442695, %v859_v42 }
 0x2a5   : > { %v1128_v46 = vmul.f32 -1.442695, %v854_v44  ;;  %v1333_v47 = vpop.f32.mrb[22].mxu0 }
 0x2a6   : > { %1426 = vpow2.f32 %v1129_v45  ;;  %v869_v48 = vadd.f32 %v1333_v47, %v1707_v28  ;;  %v863_v49 = vpop.f32.mrb[23].mxu0 }
 0x2a7   : > { %1428 = vpow2.f32 %v1128_v46  ;;  %v864_v50 = vadd.f32 %v1707_v28, %v863_v49 }
 0x2a8   : > { %v1419_v51 = vpop.eup %1418  ;;  %v1131_v52 = vmul.f32 -1.442695, %v869_v48 }
 0x2a9   : > { %v1421_v53 = vpop.eup %1420  ;;  %v961_v54 = vadd.f32 1.0, %v1419_v51  ;;  %v1130_v55 = vmul.f32 -1.442695, %v864_v50  ;;  %v1336_v56 = vpop.f32.mrb[24].mxu0 }
 0x2aa   : > { %v960_v57 = vadd.f32 1.0, %v1421_v53  ;;  %1430 = vpow2.f32 %v1131_v52  ;;  %v879_v58 = vadd.f32 %v1336_v56, %v1707_v28  ;;  %v873_v59 = vpop.f32.mrb[25].mxu0 }
 0x2ab   : > { %1432 = vrcp.f32 %v961_v54  ;;  %v874_v60 = vadd.f32 %v1707_v28, %v873_v59 }
 0x2ac   : > { %v1423_v61 = vpop.eup %1422  ;;  %1434 = vrcp.f32 %v960_v57  ;;  %v1133_v62 = vmul.f32 -1.442695, %v879_v58 }
 0x2ad   : > { %v1425_v63 = vpop.eup %1424  ;;  %v963_v0 = vadd.f32 1.0, %v1423_v61  ;;  %1436 = vpow2.f32 %v1130_v55  ;;  %v1132_v1 = vmul.f32 -1.442695, %v874_v60  ;;  %v1339_v2 = vpop.f32.mrb[26].mxu0 }
 0x2ae   : > { %v962_v3 = vadd.f32 1.0, %v1425_v63  ;;  %1438 = vpow2.f32 %v1133_v62  ;;  %v889_v4 = vadd.f32 %v1339_v2, %v1707_v28  ;;  %v883_v5 = vpop.f32.mrb[27].mxu0 }
 0x2af   : > { %1440 = vrcp.f32 %v963_v0  ;;  %v884_v6 = vadd.f32 %v1707_v28, %v883_v5 }
 0x2b0   : > { %v1427_v7 = vpop.eup %1426  ;;  %1442 = vrcp.f32 %v962_v3  ;;  %v1135_v8 = vmul.f32 -1.442695, %v889_v4 }
 0x2b1   : > { %v1429_v9 = vpop.eup %1428  ;;  %v965_v10 = vadd.f32 1.0, %v1427_v7  ;;  %1444 = vpow2.f32 %v1132_v1  ;;  %v1134_v11 = vmul.f32 -1.442695, %v884_v6  ;;  %v1342_v12 = vpop.f32.mrb[28].mxu0 }
 0x2b2   : > { %v964_v13 = vadd.f32 1.0, %v1429_v9  ;;  %1446 = vpow2.f32 %v1135_v8  ;;  %v899_v14 = vadd.f32 %v1342_v12, %v1707_v28  ;;  %v893_v15 = vpop.f32.mrb[29].mxu0 }
 0x2b3   : > { %1448 = vrcp.f32 %v965_v10  ;;  %v894_v16 = vadd.f32 %v1707_v28, %v893_v15 }
 0x2b4   : > { %v1431_v17 = vpop.eup %1430  ;;  %1450 = vrcp.f32 %v964_v13  ;;  %v1137_v18 = vmul.f32 -1.442695, %v899_v14 }
 0x2b5   : > { %v1433_v19 = vpop.eup %1432  ;;  %v967_v20 = vadd.f32 1.0, %v1431_v17  ;;  %1452 = vpow2.f32 %v1134_v11  ;;  %v1136_v21 = vmul.f32 -1.442695, %v894_v16  ;;  %v1345_v22 = vpop.f32.mrb[16].mxu1 }
 0x2b6   : > { %v1435_v23 = vpop.eup %1434  ;;  %1009 = vst [vmem:[%s1727_s28 + $0x8] sm:$0xff] %v1433_v19  ;;  %1454 = vpow2.f32 %v1137_v18  ;;  %v909_v24 = vadd.f32 %v1345_v22, %v1707_v28  ;;  %v903_v25 = vpop.f32.mrb[17].mxu1 }
 0x2b7   : > { %v1437_v26 = vpop.eup %1436  ;;  %1008 = vst [vmem:[%s1727_s28] sm:$0xff] %v1435_v23  ;;  %1456 = vrcp.f32 %v967_v20  ;;  %v904_v27 = vadd.f32 %v1707_v28, %v903_v25 }
 0x2b8   : > { %v1439_v29 = vpop.eup %1438  ;;  %v966_v30 = vadd.f32 1.0, %v1437_v26  ;;  %1458 = vpow2.f32 %v1136_v21  ;;  %v1139_v31 = vmul.f32 -1.442695, %v909_v24 }
 0x2b9   : > { %v1441_v32 = vpop.eup %1440  ;;  %v969_v33 = vadd.f32 1.0, %v1439_v29  ;;  %v1138_v34 = vmul.f32 -1.442695, %v904_v27 }
 0x2ba   : > { %v1443_v35 = vpop.eup %1442  ;;  %1011 = vst [vmem:[%s1727_s28 + $0x18] sm:$0xff] %v1441_v32  ;;  %1460 = vrcp.f32 %v966_v30 }
 0x2bb   : > { %v1445_v36 = vpop.eup %1444  ;;  %1010 = vst [vmem:[%s1727_s28 + $0x10] sm:$0xff] %v1443_v35  ;;  %1462 = vrcp.f32 %v969_v33 }
 0x2bc   : > { %v1447_v37 = vpop.eup %1446  ;;  %v968_v38 = vadd.f32 1.0, %v1445_v36  ;;  %1464 = vpow2.f32 %v1139_v31 }
 0x2bd   : > { %v1449_v28 = vpop.eup %1448  ;;  %v971_v39 = vadd.f32 1.0, %v1447_v37  ;;  %1466 = vpow2.f32 %v1138_v34 }
 0x2be   : > { %v1451_v40 = vpop.eup %1450  ;;  %1013 = vst [vmem:[%s1727_s28 + $0x28] sm:$0xff] %v1449_v28  ;;  %1468 = vrcp.f32 %v968_v38 }
 0x2bf   : > { %v1453_v41 = vpop.eup %1452  ;;  %1012 = vst [vmem:[%s1727_s28 + $0x20] sm:$0xff] %v1451_v40  ;;  %1470 = vrcp.f32 %v971_v39 }
 0x2c0   : > { %v1455_v42 = vpop.eup %1454  ;;  %v970_v43 = vadd.f32 1.0, %v1453_v41 }
 0x2c1   : > { %v1457_v44 = vpop.eup %1456  ;;  %v973_v45 = vadd.f32 1.0, %v1455_v42 }
 0x2c2   : > { %v1459_v46 = vpop.eup %1458  ;;  %1015 = vst [vmem:[%s1727_s28 + $0x38] sm:$0xff] %v1457_v44  ;;  %1472 = vrcp.f32 %v970_v43 }
 0x2c3   : > { %1474 = vrcp.f32 %v973_v45  ;;  %v972_v47 = vadd.f32 1.0, %v1459_v46 }
 0x2c4   : > { %v1461_v48 = vpop.eup %1460 }
 0x2c5   : > { %v1463_v49 = vpop.eup %1462  ;;  %1014 = vst [vmem:[%s1727_s28 + $0x30] sm:$0xff] %v1461_v48  ;;  %1476 = vrcp.f32 %v972_v47 }
 0x2c6   : > { %v1465_v50 = vpop.eup %1464  ;;  %1017 = vst [vmem:[%s1727_s28 + $0x48] sm:$0xff] %v1463_v49 }
 0x2c7   : > { %v1467_v51 = vpop.eup %1466  ;;  %v975_v52 = vadd.f32 1.0, %v1465_v50 }
 0x2c8   : > { %v1469_v53 = vpop.eup %1468  ;;  %v974_v54 = vadd.f32 1.0, %v1467_v51 }
 0x2c9   : > { %v1471_v55 = vpop.eup %1470  ;;  %1016 = vst [vmem:[%s1727_s28 + $0x40] sm:$0xff] %v1469_v53  ;;  %1478 = vrcp.f32 %v975_v52 }
 0x2ca   : > { %1019 = vst [vmem:[%s1727_s28 + $0x58] sm:$0xff] %v1471_v55  ;;  %1480 = vrcp.f32 %v974_v54 }
 0x2cc   : > { %v1473_v56 = vpop.eup %1472 }
 0x2cd   : > { %v1475_v57 = vpop.eup %1474  ;;  %1018 = vst [vmem:[%s1727_s28 + $0x50] sm:$0xff] %v1473_v56 }
 0x2ce   : > { %1021 = vst [vmem:[%s1727_s28 + $0x68] sm:$0xff] %v1475_v57 }
 0x2cf   : > { %v1477_v58 = vpop.eup %1476 }
 0x2d0   : > { %1020 = vst [vmem:[%s1727_s28 + $0x60] sm:$0xff] %v1477_v58 }
 0x2d3   : > { %v1479_v59 = vpop.eup %1478 }
 0x2d4   : > { %v1481_v60 = vpop.eup %1480  ;;  %1023 = vst [vmem:[%s1727_s28 + $0x78] sm:$0xff] %v1479_v59 }
 0x2d5   : > { %1022 = vst [vmem:[%s1727_s28 + $0x70] sm:$0xff] %v1481_v60 }
 0x2d6 PF: > { %s17_s24 = sadd.s32 1, %s1488_s24  }
 0x2d7   : > { %p14_p4 = scmp.ge.s32.totalorder %s17_s24, 4  }
 0x2d9   :  { %16 = sbr.rel (!%p14_p4) target bundleno = 1 (0x1), region = 78 }

</bundles_post_ra>
